<compile_context>
chip_gen: v5e
topology: v5e:2x2
jax: 0.10.0
libtpu: 0.0.40
codegen_flags: <defaults>
</compile_context>

<pallas_src>
import functools

import jax
import jax.numpy as jnp
from jax.experimental import pallas as pl
from jax.experimental.pallas import tpu as pltpu


def _round_up(v, m):
    return ((v + m - 1) // m) * m


# ---------------------------------------------------------------------------
# Fused softmax + aggregation kernel, tiled over destination-node rows.
#
#   scores  [H, T, Np]  bf16  pre-summed eh+ee+et scores, non-edges = -1e30
#   feat    [H, Np, D]  bf16  projected node features, head-leading layout
#   bias    [1, HDp]    f32   flattened per-head bias, zero padded
#   out     [T, HDp]    bf16
# ---------------------------------------------------------------------------
def _gat_softmax_agg_kernel(s_ref, feat_ref, b_ref, out_ref, *, n_heads, out_dim,
                            negative_slope, apply_relu):
    t_rows, hd_pad = out_ref.shape
    hd = n_heads * out_dim

    cols = []
    for h in range(n_heads):                              # H <= 2: fully unrolled
        s = s_ref[h].astype(jnp.float32)                  # [T, Np]  (bf16 -> f32)
        s = jnp.where(s > 0, s, negative_slope * s)       # LeakyReLU (f32, VPU)
        # masked edge-softmax over incoming edges (src / lane axis); non-edge
        # entries (-1e30) underflow to exactly 0 after the exp.
        m = jnp.max(s, axis=-1, keepdims=True)            # [T, 1]
        p = jnp.exp(s - m)
        denom = jnp.sum(p, axis=-1, keepdims=True)        # >= 1 (max term is 1)
        a = (p * pl.reciprocal(denom, approx=True)).astype(jnp.bfloat16)
        # aggregation on the MXU: rst[v] = sum_u a[v,u] * feat[u].
        cols.append(jnp.dot(a, feat_ref[h], preferred_element_type=jnp.float32))

    if hd_pad > hd:
        cols.append(jnp.zeros((t_rows, hd_pad - hd), jnp.float32))
    out = cols[0] if len(cols) == 1 else jnp.concatenate(cols, axis=-1)
    out = out + b_ref[...]                                # bias (zeros in padding)
    if apply_relu:
        out = jnp.maximum(out, 0.0)
    out_ref[...] = out.astype(out_ref.dtype)              # one lane-dense bf16 store


# ---------------------------------------------------------------------------
# Tile selection: biggest dst tile that fits a v7x-safe VMEM working set and
# leaves >= 2 parallel grid steps (both TensorCores busy on v7x).
# ---------------------------------------------------------------------------
def _pick_tile(n_pad, n_heads, out_dim, hd_pad, tile_dst=512, budget=40 << 20):
    d_phys = _round_up(out_dim, 128)                      # lane padding of feat in VMEM
    feat_res = n_heads * n_pad * d_phys * 2               # resident [H, Np, D] bf16

    def vmem(t):
        return (2 * n_heads * t * n_pad * 2               # double-buffered score tiles
                + 2 * t * hd_pad * 2                      # double-buffered output tiles
                + feat_res + hd_pad * 4)

    cands = [t for t in range(n_pad, 7, -8) if n_pad % t == 0]
    for t in cands:
        if t <= tile_dst and n_pad // t >= 2 and vmem(t) <= budget:
            return t
    return cands[-1]


# ---------------------------------------------------------------------------
# Layer wrapper
# ---------------------------------------------------------------------------
def gat_conv_layer(x, edge_attr, src_idx, dst_idx, params, *, n_heads, out_dim,
                   negative_slope=0.2, apply_relu=False, tile_dst=512):
    """One GATConv layer (feat_drop=attn_drop=0, residual=False, norm=None,
    bias=True, concat_out=True)."""
    n, f_in = x.shape
    e_dim = edge_attr.shape[1]
    hd = n_heads * out_dim
    n_pad = _round_up(n, 128)          # node axis: dst sublanes AND src lanes
    hd_pad = _round_up(hd, 128)        # lane-dense output width

    # ---- fold attention vectors into the projection weights (once, in XLA) ----
    w_fc = params["w_fc"]                                      # [f_in, H*D]
    w3 = w_fc.reshape(f_in, n_heads, out_dim)
    w_ah = jnp.einsum("fhd,hd->fh", w3, params["attn_h"])      # eh = x @ w_ah
    w_at = jnp.einsum("fhd,hd->fh", w3, params["attn_t"])      # et = x @ w_at
    we3 = params["w_edge"].reshape(e_dim, n_heads, out_dim)
    w_ae = jnp.einsum("fhd,hd->fh", we3, params["attn_e"])     # ee = edge_attr @ w_ae

    # ---- HOISTED projections: computed once per layer, outside the grid ----
    x_f32 = x.astype(jnp.float32)
    feat = jnp.dot(x_f32, w_fc)                                # [N, H*D]
    eh = jnp.dot(x_f32, w_ah)                                  # [N, H]  source term
    et = jnp.dot(x_f32, w_at)                                  # [N, H]  destination term
    ee = jnp.dot(edge_attr.astype(jnp.float32), w_ae)          # [E, H]  edge term

    # per-edge raw scores (pre-LeakyReLU), summed in f32 before the bf16 cast
    scores_e = eh[src_idx] + ee + et[dst_idx]                  # [E, H]

    # TODO(synk): the data-dependent scatter of the edge list into the dense
    # [H, dst, src] score matrix (and a CSR/sparse per-dst-tile formulation for
    # large graphs) has no clean static-BlockSpec equivalent; it stays as XLA
    # glue (duplicate (src, dst) edges keep only the last edge's score).
    scores_d = jnp.full((n_heads, n_pad, n_pad), -1e30, dtype=jnp.bfloat16)
    scores_d = scores_d.at[:, dst_idx, src_idx].set(scores_e.T.astype(jnp.bfloat16))

    # feat in head-leading layout [H, Np, D] (leading-axis index is free in-kernel)
    feat_p = jnp.zeros((n_heads, n_pad, out_dim), jnp.float32)
    feat_p = feat_p.at[:, :n, :].set(feat.reshape(n, n_heads, out_dim).transpose(1, 0, 2))
    feat_bf = feat_p.astype(jnp.bfloat16)

    bias_p = jnp.zeros((1, hd_pad), jnp.float32).at[0, :hd].set(params["bias"].reshape(-1))

    tile = _pick_tile(n_pad, n_heads, out_dim, hd_pad, tile_dst)

    kern = functools.partial(_gat_softmax_agg_kernel, n_heads=n_heads, out_dim=out_dim,
                             negative_slope=negative_slope, apply_relu=apply_relu)
    out = pl.pallas_call(
        kern,
        out_shape=jax.ShapeDtypeStruct((n_pad, hd_pad), jnp.bfloat16),
        grid=(n_pad // tile,),
        in_specs=[
            pl.BlockSpec((n_heads, tile, n_pad), lambda i: (0, i, 0)),     # scores (dst tile)
            pl.BlockSpec((n_heads, n_pad, out_dim), lambda i: (0, 0, 0)),  # feat (grid-invariant)
            pl.BlockSpec((1, hd_pad), lambda i: (0, 0)),                   # bias
        ],
        out_specs=pl.BlockSpec((tile, hd_pad), lambda i: (i, 0)),
        compiler_params=pltpu.CompilerParams(
            dimension_semantics=("parallel",),     # dst tiles are independent rows
            vmem_limit_bytes=48 * 1024 * 1024),    # safe on v5e/v6e (128 MiB) and v7x (64 MiB)
    )(scores_d, feat_bf, bias_p)

    return out[:n, :hd]


def gat_forward(x, edge_attr, src_idx, dst_idx, layer_params):
    """Multi-layer GAT forward (head = Identity, intermediate activation = ReLU)."""
    h = x
    n_layers = len(layer_params)
    for i, p in enumerate(layer_params):
        h = gat_conv_layer(h, edge_attr, src_idx, dst_idx, p,
                           n_heads=p["n_heads"], out_dim=p["out_dim"],
                           negative_slope=0.2,
                           apply_relu=(i < n_layers - 1))
    return h


# ---------------------------------------------------------------------------
# Parameter init (deterministic, xavier-normal-like, gain for ReLU)
# ---------------------------------------------------------------------------
def _xavier(key, shape, gain=jnp.sqrt(2.0)):
    fan_in, fan_out = shape[0], shape[-1]
    std = gain * jnp.sqrt(2.0 / (fan_in + fan_out))
    return std * jax.random.normal(key, shape, dtype=jnp.float32)


def make_layer_params(key, in_dim, e_dim, out_dim, n_heads):
    k = jax.random.split(key, 5)
    return {
        "w_fc":   _xavier(k[0], (in_dim, n_heads * out_dim)),
        "w_edge": _xavier(k[1], (e_dim, n_heads * out_dim)),
        "attn_h": _xavier(k[2], (n_heads, out_dim)),
        "attn_e": _xavier(k[3], (n_heads, out_dim)),
        "attn_t": _xavier(k[4], (n_heads, out_dim)),
        "bias":   jnp.zeros((n_heads, out_dim), jnp.float32),
        "n_heads": n_heads,
        "out_dim": out_dim,
    }


# ---------------------------------------------------------------------------
# Main
# ---------------------------------------------------------------------------
if __name__ == "__main__":
    key = jax.random.PRNGKey(0)

    # Model config: GAT(n_dim=12, e_dim=6, hidden_dim=8, out_dim=8, n_layers=2,
    #                   n_heads=2, n_heads_out=1, activation='relu', concat_out=True)
    N, n_dim, e_dim = 16, 12, 6
    hidden_dim, out_dim = 8, 8
    n_heads, n_heads_out = 2, 1

    # Synthetic graph: each node v receives edges from v-1, v-2, v-5 (mod N)
    # -> every node has in-degree 3 (allow_zero_in_degree not needed).
    src_list, dst_list = [], []
    for v in range(N):
        for off in (1, 2, 5):
            src_list.append((v - off) % N)
            dst_list.append(v)
    src_idx = jnp.array(src_list, dtype=jnp.int32)
    dst_idx = jnp.array(dst_list, dtype=jnp.int32)
    E = src_idx.shape[0]

    k_x, k_e, k_l1, k_l2 = jax.random.split(key, 4)
    x = jax.random.normal(k_x, (N, n_dim), dtype=jnp.float32)
    edge_attr = jax.random.normal(k_e, (E, e_dim), dtype=jnp.float32)

    layer_params = [
        make_layer_params(k_l1, n_dim, e_dim, hidden_dim, n_heads),                  # layer 1
        make_layer_params(k_l2, hidden_dim * n_heads, e_dim, out_dim, n_heads_out),  # layer 2
    ]

    out = gat_forward(x, edge_attr, src_idx, dst_idx, layer_params)
    out = jax.block_until_ready(out)
    assert out.shape == (N, n_heads_out * out_dim)
    assert bool(jnp.all(jnp.isfinite(out.astype(jnp.float32))))
    print("KERNEL_OK")
</pallas_src>

<mosaic_0001>
module attributes {stable_mosaic.version = 11 : i64} {
  func.func @_gat_softmax_agg_kernel(%arg0: i32, %arg1: memref<2x64x128xbf16, #tpu.memory_space<vmem>>, %arg2: memref<2x128x8xbf16, #tpu.memory_space<vmem>>, %arg3: memref<1x128xf32, #tpu.memory_space<vmem>>, %arg4: memref<64x128xbf16, #tpu.memory_space<vmem>>) attributes {dimension_semantics = [#tpu.dimension_semantics<parallel>], iteration_bounds = array<i64: 2>, scalar_prefetch = 0 : i64, scratch_operands = 0 : i64, tpu.core_type = #tpu.core_type<tc>, window_params = [{transform_indices = @transform_0, window_bounds = array<i64: 2, 64, 128>}, {pipeline_mode = #tpu.pipeline_mode<synchronous>, transform_indices = @transform_1, window_bounds = array<i64: 2, 128, 8>}, {pipeline_mode = #tpu.pipeline_mode<synchronous>, transform_indices = @transform_2, window_bounds = array<i64: 1, 128>}, {transform_indices = @transform_3, window_bounds = array<i64: 64, 128>}]} {
    %c0 = arith.constant 0 : index
    %c0_0 = arith.constant 0 : index
    %c0_1 = arith.constant 0 : index
    %0 = vector.load %arg1[%c0, %c0_0, %c0_1] : memref<2x64x128xbf16, #tpu.memory_space<vmem>>, vector<1x64x128xbf16>
    %1 = vector.shape_cast %0 : vector<1x64x128xbf16> to vector<64x128xbf16>
    %2 = arith.extf %1 : vector<64x128xbf16> to vector<64x128xf32>
    %cst = arith.constant 0.000000e+00 : f32
    %3 = vector.broadcast %cst : f32 to vector<64x128xf32>
    %4 = arith.cmpf ogt, %2, %3 : vector<64x128xf32>
    %cst_2 = arith.constant 2.000000e-01 : f32
    %5 = vector.broadcast %cst_2 : f32 to vector<64x128xf32>
    %6 = arith.mulf %5, %2 : vector<64x128xf32>
    %7 = arith.select %4, %2, %6 : vector<64x128xi1>, vector<64x128xf32>
    %cst_3 = arith.constant dense<0xFF800000> : vector<64xf32>
    %8 = vector.multi_reduction <maximumf>, %7, %cst_3 [1] : vector<64x128xf32> to vector<64xf32>
    %9 = vector.shape_cast %8 : vector<64xf32> to vector<64x1xf32>
    %10 = vector.broadcast %9 : vector<64x1xf32> to vector<64x128xf32>
    %11 = arith.subf %7, %10 : vector<64x128xf32>
    %12 = math.exp %11 : vector<64x128xf32>
    %cst_4 = arith.constant dense<0.000000e+00> : vector<64xf32>
    %13 = vector.multi_reduction <add>, %12, %cst_4 [1] : vector<64x128xf32> to vector<64xf32>
    %14 = vector.shape_cast %13 : vector<64xf32> to vector<64x1xf32>
    %15 = tpu.reciprocal %14 {approx = true} : vector<64x1xf32> -> vector<64x1xf32>
    %16 = vector.broadcast %15 : vector<64x1xf32> to vector<64x128xf32>
    %17 = arith.mulf %12, %16 : vector<64x128xf32>
    %18 = arith.truncf %17 : vector<64x128xf32> to vector<64x128xbf16>
    %c0_5 = arith.constant 0 : index
    %c0_6 = arith.constant 0 : index
    %c0_7 = arith.constant 0 : index
    %19 = vector.load %arg2[%c0_5, %c0_6, %c0_7] : memref<2x128x8xbf16, #tpu.memory_space<vmem>>, vector<1x128x8xbf16>
    %20 = vector.shape_cast %19 : vector<1x128x8xbf16> to vector<128x8xbf16>
    %cst_8 = arith.constant dense<0.000000e+00> : vector<64x8xf32>
    %21 = tpu.matmul %18, %20, %cst_8 {dimension_numbers = #tpu.dot_dimension_numbers<[1], [0], [0], [1], [0, 0, 1, 1], [], []>} : vector<64x128xbf16>, vector<128x8xbf16>, vector<64x8xf32> -> vector<64x8xf32>
    %c1 = arith.constant 1 : index
    %c0_9 = arith.constant 0 : index
    %c0_10 = arith.constant 0 : index
    %22 = vector.load %arg1[%c1, %c0_9, %c0_10] : memref<2x64x128xbf16, #tpu.memory_space<vmem>>, vector<1x64x128xbf16>
    %23 = vector.shape_cast %22 : vector<1x64x128xbf16> to vector<64x128xbf16>
    %24 = arith.extf %23 : vector<64x128xbf16> to vector<64x128xf32>
    %cst_11 = arith.constant 0.000000e+00 : f32
    %25 = vector.broadcast %cst_11 : f32 to vector<64x128xf32>
    %26 = arith.cmpf ogt, %24, %25 : vector<64x128xf32>
    %cst_12 = arith.constant 2.000000e-01 : f32
    %27 = vector.broadcast %cst_12 : f32 to vector<64x128xf32>
    %28 = arith.mulf %27, %24 : vector<64x128xf32>
    %29 = arith.select %26, %24, %28 : vector<64x128xi1>, vector<64x128xf32>
    %cst_13 = arith.constant dense<0xFF800000> : vector<64xf32>
    %30 = vector.multi_reduction <maximumf>, %29, %cst_13 [1] : vector<64x128xf32> to vector<64xf32>
    %31 = vector.shape_cast %30 : vector<64xf32> to vector<64x1xf32>
    %32 = vector.broadcast %31 : vector<64x1xf32> to vector<64x128xf32>
    %33 = arith.subf %29, %32 : vector<64x128xf32>
    %34 = math.exp %33 : vector<64x128xf32>
    %cst_14 = arith.constant dense<0.000000e+00> : vector<64xf32>
    %35 = vector.multi_reduction <add>, %34, %cst_14 [1] : vector<64x128xf32> to vector<64xf32>
    %36 = vector.shape_cast %35 : vector<64xf32> to vector<64x1xf32>
    %37 = tpu.reciprocal %36 {approx = true} : vector<64x1xf32> -> vector<64x1xf32>
    %38 = vector.broadcast %37 : vector<64x1xf32> to vector<64x128xf32>
    %39 = arith.mulf %34, %38 : vector<64x128xf32>
    %40 = arith.truncf %39 : vector<64x128xf32> to vector<64x128xbf16>
    %c1_15 = arith.constant 1 : index
    %c0_16 = arith.constant 0 : index
    %c0_17 = arith.constant 0 : index
    %41 = vector.load %arg2[%c1_15, %c0_16, %c0_17] : memref<2x128x8xbf16, #tpu.memory_space<vmem>>, vector<1x128x8xbf16>
    %42 = vector.shape_cast %41 : vector<1x128x8xbf16> to vector<128x8xbf16>
    %cst_18 = arith.constant dense<0.000000e+00> : vector<64x8xf32>
    %43 = tpu.matmul %40, %42, %cst_18 {dimension_numbers = #tpu.dot_dimension_numbers<[1], [0], [0], [1], [0, 0, 1, 1], [], []>} : vector<64x128xbf16>, vector<128x8xbf16>, vector<64x8xf32> -> vector<64x8xf32>
    %cst_19 = arith.constant 0.000000e+00 : f32
    %44 = vector.broadcast %cst_19 : f32 to vector<64x112xf32>
    %45 = tpu.concatenate %21, %43, %44 in 1 : vector<64x8xf32>, vector<64x8xf32>, vector<64x112xf32> -> vector<64x128xf32>
    %c0_20 = arith.constant 0 : index
    %c0_21 = arith.constant 0 : index
    %46 = vector.load %arg3[%c0_20, %c0_21] : memref<1x128xf32, #tpu.memory_space<vmem>>, vector<1x128xf32>
    %47 = vector.broadcast %46 : vector<1x128xf32> to vector<64x128xf32>
    %48 = arith.addf %45, %47 : vector<64x128xf32>
    %cst_22 = arith.constant 0.000000e+00 : f32
    %49 = vector.broadcast %cst_22 : f32 to vector<64x128xf32>
    %50 = arith.maximumf %48, %49 : vector<64x128xf32>
    %51 = arith.truncf %50 : vector<64x128xf32> to vector<64x128xbf16>
    %c0_23 = arith.constant 0 : index
    %c0_24 = arith.constant 0 : index
    %52 = vector.load %arg4[%c0_23, %c0_24] : memref<64x128xbf16, #tpu.memory_space<vmem>>, vector<64x128xbf16>
    tpu.vector_store %arg4[%c0_23, %c0_24], %51 {strides = array<i32>} : memref<64x128xbf16, #tpu.memory_space<vmem>>, vector<64x128xbf16>,
    return
  }
  func.func @transform_0(%arg0: i32) -> (i32, i32, i32) {
    %c0_i32 = arith.constant 0 : i32
    %c0_i32_0 = arith.constant 0 : i32
    %c0_i32_1 = arith.constant 0 : i32
    return %c0_i32, %arg0, %c0_i32_0 : i32, i32, i32
  }
  func.func @transform_1(%arg0: i32) -> (i32, i32, i32) {
    %c0_i32 = arith.constant 0 : i32
    %c0_i32_0 = arith.constant 0 : i32
    %c0_i32_1 = arith.constant 0 : i32
    %c0_i32_2 = arith.constant 0 : i32
    return %c0_i32, %c0_i32_0, %c0_i32_1 : i32, i32, i32
  }
  func.func @transform_2(%arg0: i32) -> (i32, i32) {
    %c0_i32 = arith.constant 0 : i32
    %c0_i32_0 = arith.constant 0 : i32
    %c0_i32_1 = arith.constant 0 : i32
    return %c0_i32, %c0_i32_0 : i32, i32
  }
  func.func @transform_3(%arg0: i32) -> (i32, i32) {
    %c0_i32 = arith.constant 0 : i32
    %c0_i32_0 = arith.constant 0 : i32
    return %arg0, %c0_i32 : i32, i32
  }
}

</mosaic_0001>

<bundles_post_ra>
// kernel: tpu_custom_call.1
= control target key start
LH: loop header
LB: loop body
LE: loop exit
PB: predicated region body
PF: predicated region fallthrough
CT: control target
= control target key end

     0   :  { %8 = vsyncpa [#allocation4], 0  ;;  %s1555_s0 = inlined_call_operand.vmem [shape: bf16[2,128,128], index: 0, kind: input, shape index: {}]   ;;  %s1556_s1 = inlined_call_operand.vmem [shape: bf16[2,128,8], index: 1, kind: input, shape index: {}]   ;;  %s1557_s2 = inlined_call_operand.vmem [shape: f32[1,128], index: 2, kind: input, shape index: {}]   ;;  %s1558_s3 = inlined_call_operand.hbm [shape: bf16[128,128], index: 3, kind: output, shape index: {}]  }
   0x1   :  { %10 = vsyncpa [#allocation4 + $0x1], 0  ;;  %s1257_s12 = smov 0   ;;  %s1259_s13 = smov 0  }
   0x2   :  { %s1261_s14 = smov 0   ;;  %s1263_s15 = smov 0  }
   0x3 LB: > { %s864_s16 = sadd.s32 4294967295, %s1232_s15   ;;  %s865_s17 = sadd.s32 4294967294, %s1232_s15   ;;  %s1232_s15 = sphi %s1263_s15, %s1564_s15   ;;  %s1228_s14 = sphi %s1261_s14, %s1563_s14   ;;  %s1224_s13 = sphi %s1259_s13, %s1562_s13   ;;  %s1220_s12 = sphi %s1257_s12, %s1561_s12  }
   0x4   : > { %s1280_s18 = sadd.s32 1, %s1232_s15   ;;  %s23_s19 = sadd.s32 1, %s1228_s14 }
   0x5   : > { %s20_s20 = ssub.s32 %s1232_s15, %s1280_s18  ;;  %p30_p0 = scmp.ne.s32.totalorder %s1228_s14, %s1224_s13 }
   0x6   : > { %p21_p1 = scmp.eq.s32.totalorder %s20_s20, 0  ;;  %p31_p2 = scmp.eq.s32.totalorder %s1232_s15, 0 }
   0x7   : > { %p102_p3 = scmp.eq.s32.totalorder %s864_s16, 1  ;;  %p107_p4 = scmp.ne.s32.totalorder %s1224_s13, %s1220_s12 }
   0x8   : > { %s1293_s21 = scalar_select %p21_p1, %s1228_s14, %s23_s19  }
   0x9   : > { %p32_p5 = por %p31_p2, %p30_p0  ;;  %p1295_p6 = por %p102_p3, %p30_p0 }
   0xa   : > { %p108_p7 = scmp.eq.s32.totalorder %s865_s17, 1  ;;  %p867_p9 = scmp.ge.s32.totalorder %s1232_s15, 2 }
   0xc   : > { %p1299_p8 = por %p108_p7, %p107_p4  ;;  %130 = sbr.rel (%p867_p9) target bundleno = 29 (0x1d), region = 24 }
  0x11   : > { %133 = sbr.rel (!%p32_p5) target bundleno = 29 (0x1d), region = 28  ;;  %s135_s24 = sand.u32 (%p32_p5), 1, %s1228_s14  }
  0x12   : > { %s967_s25 = sshll.u32 (%p32_p5), %s1232_s15, 5  ;;  %s868_s26 = sshll.u32 (%p32_p5), %s135_s24, 6 }
  0x13   : > { %s140_s29 = scalar_lea.vmem (%p32_p5), %s1555_s0, %s967_s25  ;;  %s137_s30 = scalar_lea.vmem (%p32_p5), [#allocation2], %s868_s26 }
  0x14   : > { %v157_v0 = vld [vmem:[%s140_s29] sm:$0xff] (%p32_p5)   ;;  %v161_v1 = vld [vmem:[%s140_s29 + $0x8] sm:$0xff] (%p32_p5)   ;;  %v165_v2 = vld [vmem:[%s140_s29 + $0x10] sm:$0xff] (%p32_p5)  }
  0x15   : > { %158 = vst [vmem:[%s137_s30] sm:$0xff] (%p32_p5), %v157_v0   ;;  %v169_v3 = vld [vmem:[%s140_s29 + $0x18] sm:$0xff] (%p32_p5)   ;;  %v173_v4 = vld [vmem:[%s140_s29 + $0x40] sm:$0xff] (%p32_p5)   ;;  %v177_v5 = vld [vmem:[%s140_s29 + $0x48] sm:$0xff] (%p32_p5)  }
  0x16   : > { %162 = vst [vmem:[%s137_s30 + $0x8] sm:$0xff] %v161_v1   ;;  %v181_v6 = vld [vmem:[%s140_s29 + $0x50] sm:$0xff]   ;;  %v185_v7 = vld [vmem:[%s140_s29 + $0x58] sm:$0xff]  }
  0x17   : > { %166 = vst [vmem:[%s137_s30 + $0x10] sm:$0xff] %v165_v2  }
  0x18   : > { %170 = vst [vmem:[%s137_s30 + $0x18] sm:$0xff] %v169_v3  }
  0x19   : > { %174 = vst [vmem:[%s137_s30 + $0x20] sm:$0xff] %v173_v4  }
  0x1a   : > { %178 = vst [vmem:[%s137_s30 + $0x28] sm:$0xff] %v177_v5  }
  0x1b   : > { %182 = vst [vmem:[%s137_s30 + $0x30] sm:$0xff] %v181_v6  }
  0x1c   : > { %186 = vst [vmem:[%s137_s30 + $0x38] sm:$0xff] %v185_v7  }
  0x1d PF: > { %p871_p10 = scmp.ge.s32.totalorder %s1232_s15, 1  ;;  %p243_p11 = scmp.lt.s32.totalorder %s1232_s15, 3 }
  0x1f   : > { %p244_p12 = pnand %p871_p10, %p243_p11 }
  0x20   : > { %s1314_s4 = sand.u32 (!%p244_p12), 1, %s1224_s13   ;;  %s984_s10 = sshll.u32 (!%p244_p12), %s864_s16, 5 }
  0x21   : > { %247 = sbr.rel (%p244_p12) target bundleno = 595 (0x253), region = 69  ;;  %s872_s5 = sshll.u32 (!%p244_p12), %s1314_s4, 6 }
  0x22   : > { %s1317_s6 = scalar_lea.vmem (!%p244_p12), [#allocation2], %s872_s5  ;;  %s1234_s5 = smov (!%p244_p12), 8  }
  0x23   : > { %s873_s8 = sshll.u32 (!%p244_p12), %s1314_s4, 5  ;;  %s793_s19 = scalar_lea.hbm (!%p244_p12), %s1558_s3, %s984_s10 }
  0x24   : > { %s1503_s9 = scalar_lea.vmem (!%p244_p12), [#allocation3], %s873_s8  ;;  %s1521_s20 = sshll.u32 (!%p244_p12), %s793_s19, 4  ;;  %s797_s20 = int_to_ptr.hbm [resolvable:$true] %s1521_s20 }
  0x25   : > { %s794_s16 = sshll.u32 (!%p244_p12), %s1503_s9, 4  ;;  %s782_s24 = scalar_lea.sflag (!%p244_p12), [#allocation4], %s1314_s4  ;;  %s795_s16 = int_to_ptr.vmem [resolvable:$true] %s794_s16 }
  0x26   : > { %v1042_v8 = vld [vmem:[%s1317_s6 + $0x30] sm:$0xff]   ;;  %v1040_v9 = vld [vmem:[%s1317_s6 + $0x20] sm:$0xff]   ;;  %v1043_v10 = vld [vmem:[%s1317_s6 + $0x38] sm:$0xff]   ;;  %s1184_s25 = sshra.s32 %s797_s20, 4  ;;  %s1190_s29 = scalar_lea.hbm %s1558_s3, 64  ;;  %s1185_s25 = int_to_ptr.hbm [resolvable:$true] %s1184_s25 }
  0x27   : > { %v1011_v11 = vunpack.c.l.bf16 %v1042_v8  ;;  %v1003_v12 = vunpack.c.l.bf16 %v1040_v9  ;;  %v1015_v13 = vunpack.c.l.bf16 %v1043_v10  ;;  %v1012_v14 = vunpack.c.h.bf16 %v1042_v8  ;;  %v1041_v26 = vld [vmem:[%s1317_s6 + $0x28] sm:$0xff]   ;;  %v1038_v27 = vld [vmem:[%s1317_s6 + $0x10] sm:$0xff]   ;;  %v986_v37 = vld [vmem:[%s1317_s6] sm:$0xff]   ;;  %s1186_s26 = scalar_lea.hbm %s1185_s25, 32  ;;  %p1191_p2 = scmp.lt.s32.totalorder %s1185_s25, %s1558_s3 }
  0x28   : > { %v1004_v15 = vunpack.c.h.bf16 %v1040_v9  ;;  %v1016_v19 = vunpack.c.h.bf16 %v1043_v10  ;;  %v1007_v30 = vunpack.c.l.bf16 %v1041_v26  ;;  %v1008_v31 = vunpack.c.h.bf16 %v1041_v26  ;;  %v1039_v47 = vld [vmem:[%s1317_s6 + $0x18] sm:$0xff]   ;;  %v1037_v62 = vld [vmem:[%s1317_s6 + $0x8] sm:$0xff]   ;;  %p1187_p13 = scmp.ne.s32.totalorder %s1185_s25, %s1186_s26  ;;  %p1192_p3 = scmp.lt.s32.totalorder %s1190_s29, %s1186_s26 }
  0x29   : > { %vm505_vm0 = vcmp.gt.f32.partialorder %v1011_v11, 0.0  ;;  %v513_v16 = vmul.f32 0.2, %v1011_v11  ;;  %vm501_vm1 = vcmp.gt.f32.partialorder %v1003_v12, 0.0  ;;  %v509_v17 = vmul.f32 0.2, %v1003_v12 }
  0x2a   : > { %vm507_vm2 = vcmp.gt.f32.partialorder %v1015_v13, 0.0  ;;  %v515_v18 = vmul.f32 0.2, %v1015_v13  ;;  %v514_v23 = vmul.f32 0.2, %v1012_v14  ;;  %vm506_vm3 = vcmp.gt.f32.partialorder %v1012_v14, 0.0  ;;  %p1188_p0 = pnand %p1187_p13, %p1295_p6  ;;  %p1193_p4 = por %p1192_p3, %p1191_p2 }
  0x2b   : > { %v1322_v20 = vsel %vm505_vm0, %v1011_v11, %v513_v16  ;;  %v1324_v21 = vsel %vm501_vm1, %v1003_v12, %v509_v17  ;;  %v510_v24 = vmul.f32 0.2, %v1004_v15  ;;  %vm502_vm4 = vcmp.gt.f32.partialorder %v1004_v15, 0.0 }
  0x2c   : > { %533 = vmax.xlane.f32.xlu0 %v1322_v20  ;;  %525 = vmax.xlane.f32.xlu1 %v1324_v21  ;;  %v1328_v22 = vsel %vm507_vm2, %v1015_v13, %v515_v18  ;;  %v516_v25 = vmul.f32 0.2, %v1016_v19  ;;  %vm508_vm5 = vcmp.gt.f32.partialorder %v1016_v19, 0.0  ;;  %v522_v28 = vsel %vm506_vm3, %v1012_v14, %v514_v23  ;;  %p1189_p1 = pneg %p1188_p0 }
  0x2d   : > { %537 = vmax.xlane.f32.xlu2 %v1328_v22  ;;  %v518_v29 = vsel %vm502_vm4, %v1004_v15, %v510_v24  ;;  %v995_v33 = vunpack.c.l.bf16 %v1038_v27  ;;  %v511_v34 = vmul.f32 0.2, %v1007_v30  ;;  %v512_v35 = vmul.f32 0.2, %v1008_v31 }
  0x2e   : > { %v1333_v32 = vsel %vm508_vm5, %v1016_v19, %v516_v25  ;;  %vm503_vm6 = vcmp.gt.f32.partialorder %v1007_v30, 0.0  ;;  %vm504_vm7 = vcmp.gt.f32.partialorder %v1008_v31, 0.0  ;;  %v996_v40 = vunpack.c.h.bf16 %v1038_v27  ;;  %p1194_p5 = pnand %p1193_p4, %p1189_p1 }
  0x2f   : > { %v303_v36 = vmul.f32 0.2, %v995_v33  ;;  %vm295_vm8 = vcmp.gt.f32.partialorder %v995_v33, 0.0  ;;  %v1337_v38 = vsel %vm503_vm6, %v1007_v30, %v511_v34  ;;  %v1339_v39 = vsel %vm504_vm7, %v1008_v31, %v512_v35  ;;  %v983_v35 = vld [vmem:[%s1556_s1 + $0x78] sm:$0xff] }
  0x30   : > { %v987_v41 = vunpack.c.l.bf16 %v986_v37  ;;  %v988_v43 = vunpack.c.h.bf16 %v986_v37  ;;  %v304_v44 = vmul.f32 0.2, %v996_v40  ;;  %vm296_vm9 = vcmp.gt.f32.partialorder %v996_v40, 0.0  ;;  %1055 = vmatpush.bf16.msra.mxu3 %v983_v35  ;;  %666 = vmatpush.bf16.msra.mxu1 %v983_v35 }
  0x31   : > { %v1341_v42 = vsel %vm295_vm8, %v995_v33, %v303_v36  ;;  %v1000_v50 = vunpack.c.h.bf16 %v1039_v47  ;;  %v999_v52 = vunpack.c.l.bf16 %v1039_v47  ;;  %v991_v4 = vunpack.c.l.bf16 %v1037_v62 }
  0x32   : > { %v299_v45 = vmul.f32 0.2, %v987_v41  ;;  %v300_v46 = vmul.f32 0.2, %v988_v43  ;;  %vm291_vm10 = vcmp.gt.f32.partialorder %v987_v41, 0.0  ;;  %vm292_vm11 = vcmp.gt.f32.partialorder %v988_v43, 0.0 }
  0x33   : > { %v1347_v48 = vsel %vm296_vm9, %v996_v40, %v304_v44  ;;  %v306_v53 = vmul.f32 0.2, %v1000_v50  ;;  %vm298_vm12 = vcmp.gt.f32.partialorder %v1000_v50, 0.0  ;;  %v305_v54 = vmul.f32 0.2, %v999_v52 }
  0x34   : > { %535 = vmax.xlane.f32.xlu0 %v522_v28  ;;  %527 = vmax.xlane.f32.xlu1 %v518_v29  ;;  %v1349_v49 = vsel %vm291_vm10, %v987_v41, %v299_v45  ;;  %v1351_v51 = vsel %vm292_vm11, %v988_v43, %v300_v46  ;;  %vm297_vm13 = vcmp.gt.f32.partialorder %v999_v52, 0.0  ;;  %v301_v11 = vmul.f32 0.2, %v991_v4  ;;  %v981_v45 = vld [vmem:[%s1556_s1 + $0x68] sm:$0xff] }
  0x35   : > { %539 = vmax.xlane.f32.xlu2 %v1333_v32  ;;  %v1356_v55 = vsel %vm298_vm12, %v1000_v50, %v306_v53  ;;  %v1358_v56 = vsel %vm297_vm13, %v999_v52, %v305_v54  ;;  %vm293_vm14 = vcmp.gt.f32.partialorder %v991_v4, 0.0  ;;  %vm727_vm0 = vcmask 64512  }
  0x36   : > { %v1370_v17 = vsel %vm293_vm14, %v991_v4, %v301_v11  ;;  %v971_v4 = vld [vmem:[%s1556_s1 + $0x18] sm:$0xff]  ;;  %vm736_vm1 = vcmask 130048  }
  0x3c   : > { %529 = vmax.xlane.f32.xlu0 %v1337_v38  ;;  %531 = vmax.xlane.f32.xlu1 %v1339_v39 }
  0x3d   : > { %323 = vmax.xlane.f32.xlu2 %v1341_v42 }
  0x44   : > { %325 = vmax.xlane.f32.xlu0 %v1347_v48  ;;  %315 = vmax.xlane.f32.xlu1 %v1349_v49 }
  0x45   : > { %317 = vmax.xlane.f32.xlu2 %v1351_v51 }
  0x4c   : > { %329 = vmax.xlane.f32.xlu0 %v1356_v55 }
  0x4d   : > { %327 = vmax.xlane.f32.xlu2 %v1358_v56 }
  0x9f   : > { %v534_v57 = vpop.xlane.xlu0 %533  ;;  %v526_v58 = vpop.xlane.xlu1 %525 }
  0xa0   : > { %v545_v59 = vsub.f32 %v1322_v20, %v534_v57  ;;  %v538_v60 = vpop.xlane.xlu2 %537  ;;  %v541_v10 = vsub.f32 %v1324_v21, %v526_v58 }
  0xa1   : > { %v547_v9 = vsub.f32 %v1328_v22, %v538_v60  ;;  %v979_v60 = vld [vmem:[%s1556_s1 + $0x58] sm:$0xff] }
  0xa2   : > { %v557_v61 = vmul.f32 1.442695, %v545_v59  ;;  %v549_v16 = vmul.f32 1.442695, %v541_v10 }
  0xa3   : > { %v561_v13 = vmul.f32 1.442695, %v547_v9 }
  0xa4   : > { %1106 = vpow2.f32 %v557_v61  ;;  %v978_v61 = vld [vmem:[%s1556_s1 + $0x50] sm:$0xff] }
  0xa7   : > { %v536_v63 = vpop.xlane.xlu0 %535  ;;  %v528_v0 = vpop.xlane.xlu1 %527 }
  0xa8   : > { %v546_v1 = vsub.f32 %v522_v28, %v536_v63  ;;  %v542_v2 = vsub.f32 %v518_v29, %v528_v0  ;;  %v540_v3 = vpop.xlane.xlu2 %539  ;;  %v992_v29 = vunpack.c.h.bf16 %v1037_v62  ;;  %v975_v62 = vld [vmem:[%s1556_s1 + $0x38] sm:$0xff]  ;;  %v977_v63 = vld [vmem:[%s1556_s1 + $0x48] sm:$0xff]  ;;  %v974_v0 = vld [vmem:[%s1556_s1 + $0x30] sm:$0xff] }
  0xa9   : > { %v548_v8 = vsub.f32 %v1333_v32, %v540_v3  ;;  %455 = vmatpush.bf16.msra.mxu0 %v975_v62  ;;  %1047 = vmatpush.bf16.msra.mxu2 %v975_v62  ;;  %v972_v3 = vld [vmem:[%s1556_s1 + $0x20] sm:$0xff] }
  0xaa   : > { %v1364_v5 = vpop.eup %1106  ;;  %v559_v6 = vmul.f32 1.442695, %v546_v1  ;;  %v551_v7 = vmul.f32 1.442695, %v542_v2  ;;  %v302_v36 = vmul.f32 0.2, %v992_v29 }
  0xab   : > { %573 = vadd.xlane.f32.xlu0 %v1364_v5  ;;  %v563_v12 = vmul.f32 1.442695, %v548_v8  ;;  %vm294_vm15 = vcmp.gt.f32.partialorder %v992_v29, 0.0  ;;  %v976_v1 = vld [vmem:[%s1556_s1 + $0x40] sm:$0xff]  ;;  %v973_v2 = vld [vmem:[%s1556_s1 + $0x28] sm:$0xff] }
  0xac   : > { %1108 = vpow2.f32 %v559_v6  ;;  %v969_v8 = vld [vmem:[%s1556_s1 + $0x8] sm:$0xff] }
  0xad   : > { %1110 = vpow2.f32 %v551_v7  ;;  %456 = vmatpush.bf16.msra.mxu0 %v974_v0  ;;  %1048 = vmatpush.bf16.msra.mxu2 %v974_v0  ;;  %v970_v7 = vld [vmem:[%s1556_s1 + $0x10] sm:$0xff] }
  0xae   : > { %1112 = vpow2.f32 %v563_v12 }
  0xaf   : > { %v530_v14 = vpop.xlane.xlu0 %529  ;;  %v532_v15 = vpop.xlane.xlu1 %531  ;;  %1114 = vpow2.f32 %v561_v13  ;;  %v968_v13 = vld [vmem:[%s1556_s1] sm:$0xff] }
  0xb0   : > { %v324_v18 = vpop.xlane.xlu2 %323  ;;  %v544_v21 = vsub.f32 %v1339_v39, %v532_v15  ;;  %1116 = vpow2.f32 %v549_v16  ;;  %v543_v31 = vsub.f32 %v1337_v38, %v530_v14  ;;  %v982_v38 = vld [vmem:[%s1556_s1 + $0x70] sm:$0xff] }
  0xb1   : > { %v335_v20 = vsub.f32 %v1341_v42, %v324_v18  ;;  %v1401_v42 = vsel %vm294_vm15, %v992_v29, %v302_v36  ;;  %1056 = vmatpush.bf16.msra.mxu3 %v982_v38  ;;  %667 = vmatpush.bf16.msra.mxu1 %v982_v38 }
  0xb2   : > { %v1372_v19 = vpop.eup %1108  ;;  %v555_v24 = vmul.f32 1.442695, %v544_v21  ;;  %v553_v37 = vmul.f32 1.442695, %v543_v31  ;;  %457 = vmatpush.bf16.msra.mxu0 %v973_v2  ;;  %1049 = vmatpush.bf16.msra.mxu2 %v973_v2 }
  0xb3   : > { %v1375_v22 = vpop.eup %1110  ;;  %319 = vmax.xlane.f32.xlu0 %v1370_v17  ;;  %575 = vadd.xlane.f32.xlu1 %v1372_v19  ;;  %v347_v23 = vmul.f32 1.442695, %v335_v20 }
  0xb4   : > { %567 = vadd.xlane.f32.xlu2 %v1375_v22  ;;  %v1381_v26 = vpop.eup %1112 }
  0xb5   : > { %v1383_v30 = vpop.eup %1114  ;;  %1118 = vpow2.f32 %v347_v23  ;;  %1057 = vmatpush.bf16.msra.mxu3 %v981_v45  ;;  %668 = vmatpush.bf16.msra.mxu1 %v981_v45 }
  0xb6   : > { %v1386_v32 = vpop.eup %1116  ;;  %1120 = vpow2.f32 %v555_v24  ;;  %458 = vmatpush.bf16.msra.mxu0 %v972_v3  ;;  %1050 = vmatpush.bf16.msra.mxu2 %v972_v3 }
  0xb7   : > { %v326_v25 = vpop.xlane.xlu0 %325  ;;  %v316_v28 = vpop.xlane.xlu1 %315  ;;  %1122 = vpow2.f32 %v553_v37 }
  0xb8   : > { %v318_v27 = vpop.xlane.xlu2 %317  ;;  %v331_v34 = vsub.f32 %v1349_v49, %v316_v28  ;;  %v336_v46 = vsub.f32 %v1347_v48, %v326_v25 }
  0xb9   : > { %v332_v33 = vsub.f32 %v1351_v51, %v318_v27 }
  0xba   : > { %v339_v40 = vmul.f32 1.442695, %v331_v34  ;;  %v349_v49 = vmul.f32 1.442695, %v336_v46  ;;  %459 = vmatpush.bf16.msra.mxu0 %v971_v4  ;;  %1051 = vmatpush.bf16.msra.mxu2 %v971_v4 }
  0xbb   : > { %579 = vadd.xlane.f32.xlu0 %v1381_v26  ;;  %565 = vadd.xlane.f32.xlu1 %v1386_v32  ;;  %v341_v39 = vmul.f32 1.442695, %v332_v33  ;;  %v1399_v41 = vpop.eup %1118 }
  0xbc   : > { %577 = vadd.xlane.f32.xlu2 %v1383_v30  ;;  %v1403_v44 = vpop.eup %1120 }
  0xbd   : > { %1124 = vpow2.f32 %v341_v39  ;;  %v1413_v50 = vpop.eup %1122 }
  0xbe   : > { %1126 = vpow2.f32 %v339_v40  ;;  %460 = vmatpush.bf16.msra.mxu0 %v970_v7  ;;  %1052 = vmatpush.bf16.msra.mxu2 %v970_v7 }
  0xbf   : > { %v330_v43 = vpop.xlane.xlu0 %329  ;;  %1128 = vpow2.f32 %v349_v49 }
  0xc0   : > { %v338_v47 = vsub.f32 %v1356_v55, %v330_v43  ;;  %v328_v52 = vpop.xlane.xlu2 %327 }
  0xc1   : > { %v337_v54 = vsub.f32 %v1358_v56, %v328_v52  ;;  %v980_v56 = vld [vmem:[%s1556_s1 + $0x60] sm:$0xff] }
  0xc2   : > { %v353_v51 = vmul.f32 1.442695, %v338_v47  ;;  %1058 = vmatpush.bf16.msra.mxu3 %v980_v56  ;;  %669 = vmatpush.bf16.msra.mxu1 %v980_v56 }
  0xc3   : > { %363 = vadd.xlane.f32.xlu0 %v1399_v41  ;;  %321 = vmax.xlane.f32.xlu1 %v1401_v42  ;;  %v1415_v53 = vpop.eup %1124  ;;  %v351_v55 = vmul.f32 1.442695, %v337_v54 }
  0xc4   : > { %571 = vadd.xlane.f32.xlu2 %v1403_v44  ;;  %v1417_v48 = vpop.eup %1126  ;;  %1130 = vpow2.f32 %v353_v51  ;;  %461 = vmatpush.bf16.msra.mxu0 %v969_v8 }
  0xc5   : > { %v1423_v57 = vpop.eup %1128  ;;  %1132 = vpow2.f32 %v351_v55  ;;  %1053 = vmatpush.bf16.msra.mxu2 %v969_v8 }
  0xc6   : > { %1059 = vmatpush.bf16.msra.mxu3 %v979_v60  ;;  %670 = vmatpush.bf16.msra.mxu1 %v979_v60 }
  0xc8   : > { %462 = vmatpush.bf16.msra.mxu0 %v968_v13 }
  0xc9   : > { %1054 = vmatpush.bf16.msra.mxu2 %v968_v13 }
  0xca   : > { %v1425_v58 = vpop.eup %1130  ;;  %1060 = vmatpush.bf16.msra.mxu3 %v978_v61  ;;  %671 = vmatpush.bf16.msra.mxu1 %v978_v61 }
  0xcb   : > { %357 = vadd.xlane.f32.xlu0 %v1415_v53  ;;  %569 = vadd.xlane.f32.xlu1 %v1413_v50  ;;  %v1429_v59 = vpop.eup %1132 }
  0xcc   : > { %355 = vadd.xlane.f32.xlu2 %v1417_v48 }
  0xce   : > { %1061 = vmatpush.bf16.msra.mxu3 %v977_v63  ;;  %672 = vmatpush.bf16.msra.mxu1 %v977_v63 }
  0xd2   : > { %1062 = vmatpush.bf16.msra.mxu3 %v976_v1  ;;  %673 = vmatpush.bf16.msra.mxu1 %v976_v1 }
  0xd3   : > { %365 = vadd.xlane.f32.xlu1 %v1423_v57 }
  0xd4   : > { %369 = vadd.xlane.f32.xlu2 %v1425_v58 }
  0xdb   : > { %367 = vadd.xlane.f32.xlu1 %v1429_v59 }
 0x11e   : > { %v574_v6 = vpop.xlane.xlu0 %573 }
 0x11f   : > { %1134 = vrcp.f32 %v574_v6 }
 0x125   : > { %v1135_v15 = vpop.eup %1134 }
 0x126   : > { %v320_v9 = vpop.xlane.xlu0 %319  ;;  %v576_v10 = vpop.xlane.xlu1 %575  ;;  %v593_v21 = vmul.f32 %v1135_v15, %v1364_v5 }
 0x127   : > { %v333_v11 = vsub.f32 %v1370_v17, %v320_v9  ;;  %v568_v12 = vpop.xlane.xlu2 %567  ;;  %1136 = vrcp.f32 %v576_v10 }
 0x129   : > { %v343_v14 = vmul.f32 1.442695, %v333_v11 }
 0x12b   : > { %1138 = vpow2.f32 %v343_v14 }
 0x12c   : > { %1140 = vrcp.f32 %v568_v12 }
 0x12d   : > { %v1137_v16 = vpop.eup %1136 }
 0x12e   : > { %v580_v18 = vpop.xlane.xlu0 %579  ;;  %v566_v20 = vpop.xlane.xlu1 %565  ;;  %v594_v23 = vmul.f32 %v1137_v16, %v1372_v19 }
 0x12f   : > { %v578_v17 = vpop.xlane.xlu2 %577  ;;  %1142 = vrcp.f32 %v566_v20 }
 0x130   : > { %v599_v24 = vpack.c.bf16 %v594_v23, %v593_v21  ;;  %1144 = vrcp.f32 %v580_v18 }
 0x131   : > { %v1474_v25 = vpop.eup %1138  ;;  %1146 = vrcp.f32 %v578_v17 }
 0x132   : > { %359 = vadd.xlane.f32.xlu0 %v1474_v25  ;;  %684 = vmatmul.bf16.vlgmr.msra.gmra.mxu3 %v599_v24  ;;  %v1141_v27 = vpop.eup %1140 }
 0x133   : > { %v590_v35 = vmul.f32 %v1141_v27, %v1375_v22 }
 0x135   : > { %v1143_v31 = vpop.eup %1142 }
 0x136   : > { %v364_v28 = vpop.xlane.xlu0 %363  ;;  %v322_v29 = vpop.xlane.xlu1 %321  ;;  %v589_v19 = vmul.f32 %v1143_v31, %v1386_v32 }
 0x137   : > { %v572_v33 = vpop.xlane.xlu2 %571  ;;  %v334_v5 = vsub.f32 %v1401_v42, %v322_v29  ;;  %v1145_v34 = vpop.eup %1144 }
 0x138   : > { %v1147_v36 = vpop.eup %1146  ;;  %v597_v38 = vpack.c.bf16 %v590_v35, %v589_v19  ;;  %v596_v40 = vmul.f32 %v1145_v34, %v1381_v26 }
 0x139   : > { %v345_v37 = vmul.f32 1.442695, %v334_v5  ;;  %v595_v39 = vmul.f32 %v1147_v36, %v1383_v30 }
 0x13a   : > { %674 = vmatmul.bf16.vlgmr.msra.gmra.mxu1 %v597_v38 }
 0x13b   : > { %1148 = vpow2.f32 %v345_v37  ;;  %v600_v42 = vpack.c.bf16 %v596_v40, %v595_v39 }
 0x13c   : > { %1150 = vrcp.f32 %v572_v33 }
 0x13e   : > { %v358_v43 = vpop.xlane.xlu0 %357  ;;  %v570_v45 = vpop.xlane.xlu1 %569 }
 0x13f   : > { %1152 = vrcp.f32 %v358_v43  ;;  %v356_v46 = vpop.xlane.xlu2 %355 }
 0x140   : > { %1154 = vrcp.f32 %v356_v46 }
 0x141   : > { %v1149_v47 = vpop.eup %1148  ;;  %1156 = vrcp.f32 %v570_v45 }
 0x142   : > { %689 = vmatmul.bf16.gmra.mxu3 %v600_v42  ;;  %361 = vadd.xlane.f32.xlu1 %v1149_v47  ;;  %v1151_v22 = vpop.eup %1150  ;;  %1158 = vrcp.f32 %v364_v28  ;;  %v1105_v28 = vld [vmem:[%s1557_s2] ss:$0 sm:$0xff] }
 0x143   : > { %v592_v55 = vmul.f32 %v1151_v22, %v1403_v44 }
 0x145   : > { %v1153_v32 = vpop.eup %1152 }
 0x146   : > { %v1155_v49 = vpop.eup %1154  ;;  %v366_v51 = vpop.xlane.xlu1 %365  ;;  %v380_v30 = vmul.f32 %v1153_v32, %v1415_v53 }
 0x147   : > { %v1157_v52 = vpop.eup %1156  ;;  %1160 = vrcp.f32 %v366_v51  ;;  %v379_v26 = vmul.f32 %v1155_v49, %v1417_v48  ;;  %v370_v2 = vpop.xlane.xlu2 %369 }
 0x148   : > { %v591_v54 = vmul.f32 %v1157_v52, %v1413_v50  ;;  %v1159_v61 = vpop.eup %1158 }
 0x149   : > { %v387_v56 = vpack.c.bf16 %v380_v30, %v379_v26  ;;  %v383_v63 = vmul.f32 %v1159_v61, %v1399_v41 }
 0x14a   : > { %v598_v60 = vpack.c.bf16 %v592_v55, %v591_v54 }
 0x14b   : > { %463 = vmatmul.bf16.vlgmr.msra.gmra.mxu0 %v387_v56 }
 0x14c   : > { %679 = vmatmul.bf16.gmra.mxu1 %v598_v60 }
 0x14d   : > { %v1161_v62 = vpop.eup %1160 }
 0x14e   : > { %v384_v0 = vmul.f32 %v1161_v62, %v1423_v57  ;;  %v368_v1 = vpop.xlane.xlu1 %367 }
 0x14f   : > { %1162 = vrcp.f32 %v368_v1 }
 0x150   : > { %v389_v53 = vpack.c.bf16 %v384_v0, %v383_v63  ;;  %1164 = vrcp.f32 %v370_v2 }
 0x152   : > { %473 = vmatmul.bf16.vlgmr.msra.gmra.mxu2 %v389_v53 }
 0x155   : > { %v1163_v48 = vpop.eup %1162 }
 0x156   : > { %v1165_v50 = vpop.eup %1164  ;;  %v385_v44 = vmul.f32 %v1163_v48, %v1429_v59 }
 0x157   : > { %v386_v3 = vmul.f32 %v1165_v50, %v1425_v58 }
 0x159   : > { %v390_v4 = vpack.c.bf16 %v386_v3, %v385_v44 }
 0x162   : > { %478 = vmatmul.bf16.gmra.mxu2 %v390_v4 }
 0x1a5   : > { %v360_v6 = vpop.xlane.xlu0 %359 }
 0x1a6   : > { %1166 = vrcp.f32 %v360_v6 }
 0x1ac   : > { %v1167_v8 = vpop.eup %1166 }
 0x1ad   : > { %v381_v11 = vmul.f32 %v1167_v8, %v1474_v25 }
 0x1b5   : > { %v685_v7 = vpop.f32.mrf.mxu3  ;;  %v362_v41 = vpop.xlane.xlu1 %361 }
 0x1b6   : > { %1168 = vrcp.f32 %v362_v41  ;;  %711 = vrot.lane.b32.xlu0 %v685_v7, %s1234_s5 }
 0x1b7   : > { %v675_v57 = vpop.f32.mrf.mxu1 }
 0x1b8   : > { %703 = vrot.lane.b32.xlu2 %v675_v57, %s1234_s5 }
 0x1bc   : > { %v1169_v9 = vpop.eup %1168 }
 0x1bd   : > { %v687_v10 = vpop.f32.mrf.mxu3  ;;  %v382_v12 = vmul.f32 %v1169_v9, %v1149_v47 }
 0x1bf   : > { %v388_v59 = vpack.c.bf16 %v382_v12, %v381_v11  ;;  %v677_v13 = vpop.f32.mrf.mxu1 }
 0x1c0   : > { %705 = vrot.lane.b32.xlu0 %v677_v13, %s1234_s5 }
 0x1c1   : > { %468 = vmatmul.bf16.gmra.mxu0 %v388_v59 }
 0x1c5   : > { %v690_v58 = vpop.f32.mrf.mxu3 }
 0x1c8   : > { %v464_v21 = vpop.f32.mrf.mxu0 }
 0x1c9   : > { %v680_v14 = vpop.f32.mrf.mxu1 }
 0x1ca   : > { %707 = vrot.lane.b32.xlu1 %v680_v14, %s1234_s5 }
 0x1cd   : > { %v692_v15 = vpop.f32.mrf.mxu3 }
 0x1ce   : > { %717 = vrot.lane.b32.xlu0 %v692_v15, %s1234_s5 }
 0x1d0   : > { %v466_v33 = vpop.f32.mrf.mxu0 }
 0x1d1   : > { %v682_v16 = vpop.f32.mrf.mxu1 }
 0x1d2   : > { %715 = vrot.lane.b32.xlu1 %v690_v58, %s1234_s5  ;;  %709 = vrot.lane.b32.xlu2 %v682_v16, %s1234_s5 }
 0x1d5   : > { %v474_v18 = vpop.f32.mrf.mxu2 }
 0x1da   : > { %713 = vrot.lane.b32.xlu2 %v687_v10, %s1234_s5 }
 0x1dd   : > { %v476_v23 = vpop.f32.mrf.mxu2 }
 0x1e5   : > { %v479_v38 = vpop.f32.mrf.mxu2 }
 0x1ed   : > { %v481_v52 = vpop.f32.mrf.mxu2 }
 0x212   : > { %v704_v20 = vpop.permute.xlu2 %703 }
 0x213   : > { %v728_v25 = vsel %vm727_vm0, %v464_v21, %v704_v20 }
 0x214   : > { %v737_v29 = vsel %vm736_vm1, %v728_v25, 0.0 }
 0x215   : > { %v749_v19 = vadd.f32 %v1105_v28, %v737_v29 }
 0x217   : > { %v757_v46 = vmax.f32 %v749_v19, 0.0 }
 0x228   : > { %v712_v17 = vpop.permute.xlu0 %711 }
 0x229   : > { %v732_v27 = vsel %vm727_vm0, %v474_v18, %v712_v17 }
 0x22a   : > { %v741_v31 = vsel %vm736_vm1, %v732_v27, 0.0 }
 0x22b   : > { %v753_v35 = vadd.f32 %v1105_v28, %v741_v31 }
 0x22c   : > { %v710_v24 = vpop.permute.xlu2 %709 }
 0x22d   : > { %v761_v42 = vmax.f32 %v753_v35, 0.0 }
 0x232   : > { %v706_v5 = vpop.permute.xlu0 %705 }
 0x233   : > { %v729_v36 = vsel %vm727_vm0, %v466_v33, %v706_v5 }
 0x234   : > { %v714_v34 = vpop.permute.xlu2 %713  ;;  %v738_v39 = vsel %vm736_vm1, %v729_v36, 0.0 }
 0x235   : > { %v733_v37 = vsel %vm727_vm0, %v476_v23, %v714_v34  ;;  %v750_v43 = vadd.f32 %v1105_v28, %v738_v39 }
 0x236   : > { %v742_v40 = vsel %vm736_vm1, %v733_v37, 0.0 }
 0x237   : > { %v754_v45 = vadd.f32 %v1105_v28, %v742_v40  ;;  %v758_v47 = vmax.f32 %v750_v43, 0.0 }
 0x239   : > { %v762_v22 = vmax.f32 %v754_v45, 0.0  ;;  %v1020_v32 = vpack.c.bf16 %v758_v47, %v757_v46 }
 0x23b   : > { %v1030_v49 = vpack.c.bf16 %v762_v22, %v761_v42  ;;  %1021 = vst [vmem:[%s1503_s9] sm:$0xff] %v1020_v32  }
 0x23c   : > { %v708_v51 = vpop.permute.xlu1 %707 }
 0x23d   : > { %1045 = vst [vmem:[%s1503_s9 + $0x10] sm:$0xff] %v1030_v49  }
 0x23e   : > { %v469_v30 = vpop.f32.mrf.mxu0 }
 0x23f   : > { %v730_v54 = vsel %vm727_vm0, %v469_v30, %v708_v51 }
 0x240   : > { %v718_v26 = vpop.permute.xlu0 %717  ;;  %v739_v60 = vsel %vm736_vm1, %v730_v54, 0.0 }
 0x241   : > { %v735_v55 = vsel %vm727_vm0, %v481_v52, %v718_v26  ;;  %v751_v53 = vadd.f32 %v1105_v28, %v739_v60 }
 0x242   : > { %v744_v56 = vsel %vm736_vm1, %v735_v55, 0.0 }
 0x243   : > { %v756_v62 = vadd.f32 %v1105_v28, %v744_v56  ;;  %v759_v6 = vmax.f32 %v751_v53, 0.0 }
 0x244   : > { %v716_v61 = vpop.permute.xlu1 %715 }
 0x245   : > { %v734_v63 = vsel %vm727_vm0, %v479_v38, %v716_v61  ;;  %v764_v44 = vmax.f32 %v756_v62, 0.0 }
 0x246   : > { %v743_v0 = vsel %vm736_vm1, %v734_v63, 0.0  ;;  %v471_v1 = vpop.f32.mrf.mxu0 }
 0x247   : > { %v755_v2 = vadd.f32 %v1105_v28, %v743_v0  ;;  %v731_v48 = vsel %vm727_vm0, %v471_v1, %v710_v24 }
 0x248   : > { %v740_v50 = vsel %vm736_vm1, %v731_v48, 0.0 }
 0x249   : > { %v763_v3 = vmax.f32 %v755_v2, 0.0  ;;  %v752_v4 = vadd.f32 %v1105_v28, %v740_v50 }
 0x24b   : > { %v1035_v7 = vpack.c.bf16 %v764_v44, %v763_v3  ;;  %v760_v41 = vmax.f32 %v752_v4, 0.0 }
 0x24d   : > { %1046 = vst [vmem:[%s1503_s9 + $0x18] sm:$0xff] %v1035_v7   ;;  %v1025_v57 = vpack.c.bf16 %v760_v41, %v759_v6 }
 0x24f   : > { %1044 = vst [vmem:[%s1503_s9 + $0x8] sm:$0xff] %v1025_v57  }
 0x250   : > { %1197 = shalt.err (!%p1194_p5)
}
 0x251   : > { %s1235_s4 = smov 64   ;;  %s1236_s6 = smov 4  }
 0x252   : > { %1063 = dma.vmem_to_hbm [thread:$0]  (%p1295_p6), %s795_s16, 512, %s797_s20, %s782_s24, %s1235_s4, %s1235_s4, %s1236_s6  }
 0x253 PF: > { %s811_s7 = sand.u32 1, %s1220_s12   ;;  %p1066_p7 = pnand %p867_p9, %p1299_p8 }
 0x254   : > { %s812_s8 = scalar_lea.sflag [#allocation4], %s811_s7 }
 0x255   : > { %p1067_p10 = pneg %p1066_p7 }
 0x257   : > { %1215 = dma.done.wait (%p1067_p10), %s812_s8, 512  }
 0x258   : > { %1217 = vsyncadd (%p1067_p10), %s812_s8, 4294966784  ;;  %p13_p11 = scmp.ge.s32.totalorder %s1280_s18, 4   ;;  %s1561_s12 = smov %s1224_s13 }
 0x259   : > { %s1562_s13 = smov %s1228_s14  ;;  %s1563_s14 = smov %s1293_s21 }
 0x25a   : > { %s1564_s15 = smov %s1280_s18  ;;  %15 = sbr.rel (!%p13_p11) target bundleno = 3 (0x3), region = 115 }
 0x25f   :  { %818 = vsyncpa [#allocation4], 1 }
 0x260   :  { %820 = vsyncpa [#allocation4 + $0x1], 1 }

</bundles_post_ra>
